<compile_context>
chip_gen: v7x
topology: tpu7x:2x2x1
jax: 0.10.0
libtpu: 0.0.40
codegen_flags: <defaults>
</compile_context>

<pallas_src>
import functools

import jax
import jax.numpy as jnp
from jax.experimental import pallas as pl
from jax.experimental.pallas import tpu as pltpu


def _round_up(a, b):
    return ((a + b - 1) // b) * b


def _device_kind():
    try:
        return jax.devices()[0].device_kind.lower()
    except Exception:
        return ""


def _num_tensorcores():
    # v7x packs 2 TensorCores per chip; v5e / v6e have 1.
    return 2 if "v7" in _device_kind() else 1


def _mxu_feature_align():
    # v6e / v7x have a 2x256x256 MXU -> pad feature dims > 128 to 256; v5e
    # (4x128x128) stays at 128.
    kind = _device_kind()
    return 256 if ("v6" in kind or "v7" in kind) else 128


def _pad_feature_dim(d, align):
    return _round_up(d, 128) if d <= 128 else _round_up(d, align)


def _sublane_pack(dtype):
    # Rows per packed sublane group: 8 (f32), 16 (bf16), 32 (int8 / fp8).
    itemsize = max(1, jnp.dtype(dtype).itemsize)
    return 8 * max(1, 4 // itemsize)


def _make_mlp_kernel(num_layers):
    """Fused kernel: x -> L1 -> relu -> ... -> relu -> L_num_layers."""

    def kernel(x_ref, *refs):
        o_ref = refs[-1]
        h = x_ref[...]                       # native dtype straight into the MXU
        for i in range(num_layers):
            w_ref = refs[2 * i]
            b_ref = refs[2 * i + 1]
            # Native-dtype matmul, f32 accumulation on the MXU.
            acc = jnp.dot(h, w_ref[...], preferred_element_type=jnp.float32)
            acc = acc + b_ref[...].astype(jnp.float32)
            if i < num_layers - 1:
                # Bias-add / ReLU in f32, then back to the compute dtype for
                # the next matmul (no-op when params are f32).
                h = jnp.maximum(acc, 0.0).astype(x_ref.dtype)
            else:
                h = acc
        o_ref[...] = h.astype(o_ref.dtype)

    return kernel


def prepare_mlp_params(weights, biases, dtype=None):
    """Pad (and optionally cast) the MLP parameters ONCE, at init time.

    weights[i]: [d_in_i, d_out_i], biases[i]: [d_out_i] or [1, d_out_i].
    Feature dims are padded lane-dense / MXU-aligned so the per-call jitted
    path does zero extra HBM passes over the parameters.
    """
    align = _mxu_feature_align()
    w_pad, b_pad = [], []
    for w, b in zip(weights, biases):
        d_in, d_out = w.shape
        dip = _pad_feature_dim(d_in, align)
        dop = _pad_feature_dim(d_out, align)
        wp = jnp.pad(w, ((0, dip - d_in), (0, dop - d_out)))
        bp = jnp.pad(b.reshape(1, -1), ((0, 0), (0, dop - d_out)))
        if dtype is not None:
            wp = wp.astype(dtype)
            bp = bp.astype(dtype)
        w_pad.append(wp)
        b_pad.append(bp)
    return tuple(w_pad), tuple(b_pad)


@functools.partial(jax.jit,
                   static_argnames=("output_dim", "tile_m", "unpad_output"))
def mlp_pallas(x, weights, biases, *, output_dim=None, tile_m=2048,
               unpad_output=True):
    """x: [..., input_dim]; weights/biases: PRE-PADDED via prepare_mlp_params.

    output_dim: true (unpadded) output width, needed when unpad_output=True.
    unpad_output=False returns the padded, lane-dense buffer (saves a full
    HBM read/write pass when the consumer can index into it directly).
    """
    num_layers = len(weights)
    d_in_p = weights[0].shape[0]
    d_out_p = weights[-1].shape[-1]
    if output_dim is None:
        output_dim = d_out_p
    input_dim = x.shape[-1]
    lead_shape = x.shape[:-1]

    compute_dtype = weights[0].dtype
    x2d = x.reshape(-1, input_dim).astype(compute_dtype)
    m = x2d.shape[0]
    if input_dim != d_in_p:
        x2d = jnp.pad(x2d, ((0, 0), (0, d_in_p - input_dim)))

    sub = _sublane_pack(compute_dtype)
    num_tc = _num_tensorcores()

    # ---- row tiling: big tiles; NO row-padding copy of x (grid = cdiv, the
    # ragged last block is masked by Pallas and its rows are independent) ----
    tile = min(_round_up(tile_m, sub), _round_up(m, sub))
    steps = -(-m // tile)
    if num_tc >= 2:
        # v7x: shard the "parallel" axis across 2 TCs with an even step count.
        if steps == 1 and m > sub:
            tile = _round_up(-(-m // 2), sub)
        elif steps > 1 and steps % 2 == 1:
            tile = max(sub, _round_up(-(-m // (steps + 1)), sub))
        steps = -(-m // tile)

    # ---- VMEM budget: 2 buffers x (x tile + out tile) + double-buffered
    # params + f32 accumulator headroom; shrink the tile if it doesn't fit ---
    itemsize = jnp.dtype(compute_dtype).itemsize
    param_bytes = sum(int(w.size) * w.dtype.itemsize for w in weights)
    param_bytes += sum(int(b.size) * b.dtype.itemsize for b in biases)
    widest = max([d_in_p] + [int(w.shape[-1]) for w in weights])

    def _footprint(t):
        io = 2 * t * (d_in_p + d_out_p) * itemsize   # double-buffered x / out
        acc = 2 * t * widest * 4                     # f32 accumulator + interm.
        return io + 2 * param_bytes + acc

    budget = 48 << 20                                # safe on v7x's 64 MiB VMEM
    while _footprint(tile) > budget and tile > sub:
        tile = max(sub, _round_up(tile // 2, sub))
    steps = -(-m // tile)
    vmem_limit = int(max(16 << 20, min(budget, _footprint(tile) + (4 << 20))))
    # TODO(synk): if resident (padded) params alone ever exceed the budget,
    # fall back to a K/N-tiled grid instead of keeping them grid-resident.

    kernel = _make_mlp_kernel(num_layers)

    # x / out tiles walk over rows; weights / biases are grid-resident
    # constants (constant index_map; tiny after padding, so default double
    # buffering is fine -- pl.Buffered(1) would only matter at large widths).
    in_specs = [pl.BlockSpec((tile, d_in_p), lambda i: (i, 0))]
    params = []
    for wp, bp in zip(weights, biases):
        in_specs.append(pl.BlockSpec(wp.shape, lambda i: (0, 0)))
        in_specs.append(pl.BlockSpec(bp.shape, lambda i: (0, 0)))
        params.extend([wp, bp])

    out = pl.pallas_call(
        kernel,
        out_shape=jax.ShapeDtypeStruct((m, d_out_p), x.dtype),
        grid_spec=pltpu.PrefetchScalarGridSpec(
            num_scalar_prefetch=0,
            grid=(steps,),
            in_specs=in_specs,
            out_specs=pl.BlockSpec((tile, d_out_p), lambda i: (i, 0)),
        ),
        compiler_params=pltpu.CompilerParams(
            dimension_semantics=("parallel",),
            vmem_limit_bytes=vmem_limit,
        ),
    )(x2d, *params)

    if unpad_output and output_dim != d_out_p:
        out = out[:, :output_dim]
        return out.reshape(*lead_shape, output_dim)
    return out.reshape(*lead_shape, out.shape[-1])


def init_mlp_params(key, input_dim, hidden_dim, output_dim, num_layers,
                    dtype=jnp.float32):
    """Deterministic synthetic init matching nn.Linear shapes (W: [in, out])."""
    h = [hidden_dim] * (num_layers - 1)
    dims_in = [input_dim] + h
    dims_out = h + [output_dim]
    weights, biases = [], []
    for d_in, d_out in zip(dims_in, dims_out):
        key, kw, kb = jax.random.split(key, 3)
        bound = 1.0 / (d_in ** 0.5)
        weights.append(
            jax.random.uniform(kw, (d_in, d_out), dtype, -bound, bound))
        biases.append(
            jax.random.uniform(kb, (d_out,), dtype, -bound, bound))
    return weights, biases


def mlp_ref(x, weights, biases):
    num_layers = len(weights)
    h = x
    for i, (w, b) in enumerate(zip(weights, biases)):
        h = h @ w + b.reshape(-1)
        if i < num_layers - 1:
            h = jnp.maximum(h, 0.0)
    return h


if __name__ == "__main__":
    input_dim, hidden_dim, output_dim, num_layers = 16, 32, 8, 3
    seq, batch = 8, 2  # x: [seq, batch, input_dim] (decoder query convention)

    key = jax.random.PRNGKey(0)
    kx, kp = jax.random.split(key)
    x = jax.random.normal(kx, (seq, batch, input_dim), jnp.float32)
    weights, biases = init_mlp_params(
        kp, input_dim, hidden_dim, output_dim, num_layers)

    # Pad the parameters ONCE, outside the per-call path.
    w_pad, b_pad = prepare_mlp_params(weights, biases)

    out = mlp_pallas(x, w_pad, b_pad, output_dim=output_dim)
    out = jax.block_until_ready(out)

    ref = mlp_ref(x, weights, biases)
    assert out.shape == (seq, batch, output_dim)
    assert jnp.allclose(out, ref, atol=1e-4, rtol=1e-4)
    print("KERNEL_OK")
</pallas_src>

<mosaic_0001>
module attributes {stable_mosaic.version = 11 : i64} {
  func.func @kernel(%arg0: i32, %arg1: memref<16x128xf32, #tpu.memory_space<vmem>>, %arg2: memref<128x128xf32, #tpu.memory_space<vmem>>, %arg3: memref<1x128xf32, #tpu.memory_space<vmem>>, %arg4: memref<128x128xf32, #tpu.memory_space<vmem>>, %arg5: memref<1x128xf32, #tpu.memory_space<vmem>>, %arg6: memref<128x128xf32, #tpu.memory_space<vmem>>, %arg7: memref<1x128xf32, #tpu.memory_space<vmem>>, %arg8: memref<16x128xf32, #tpu.memory_space<vmem>>) attributes {dimension_semantics = [#tpu.dimension_semantics<parallel>], iteration_bounds = array<i64: 1>, scalar_prefetch = 0 : i64, scratch_operands = 0 : i64, tpu.core_type = #tpu.core_type<tc>, window_params = [{transform_indices = @transform_0, window_bounds = array<i64: 16, 128>}, {pipeline_mode = #tpu.pipeline_mode<synchronous>, transform_indices = @transform_1, window_bounds = array<i64: 128, 128>}, {pipeline_mode = #tpu.pipeline_mode<synchronous>, transform_indices = @transform_2, window_bounds = array<i64: 1, 128>}, {pipeline_mode = #tpu.pipeline_mode<synchronous>, transform_indices = @transform_3, window_bounds = array<i64: 128, 128>}, {pipeline_mode = #tpu.pipeline_mode<synchronous>, transform_indices = @transform_4, window_bounds = array<i64: 1, 128>}, {pipeline_mode = #tpu.pipeline_mode<synchronous>, transform_indices = @transform_5, window_bounds = array<i64: 128, 128>}, {pipeline_mode = #tpu.pipeline_mode<synchronous>, transform_indices = @transform_6, window_bounds = array<i64: 1, 128>}, {transform_indices = @transform_7, window_bounds = array<i64: 16, 128>}]} {
    %c0 = arith.constant 0 : index
    %c0_0 = arith.constant 0 : index
    %0 = vector.load %arg1[%c0, %c0_0] : memref<16x128xf32, #tpu.memory_space<vmem>>, vector<16x128xf32>
    %c0_1 = arith.constant 0 : index
    %c0_2 = arith.constant 0 : index
    %1 = vector.load %arg2[%c0_1, %c0_2] : memref<128x128xf32, #tpu.memory_space<vmem>>, vector<128x128xf32>
    %cst = arith.constant dense<0.000000e+00> : vector<16x128xf32>
    %2 = tpu.matmul %0, %1, %cst {dimension_numbers = #tpu.dot_dimension_numbers<[1], [0], [0], [1], [0, 0, 1, 1], [], []>} : vector<16x128xf32>, vector<128x128xf32>, vector<16x128xf32> -> vector<16x128xf32>
    %c0_3 = arith.constant 0 : index
    %c0_4 = arith.constant 0 : index
    %3 = vector.load %arg3[%c0_3, %c0_4] : memref<1x128xf32, #tpu.memory_space<vmem>>, vector<1x128xf32>
    %4 = vector.broadcast %3 : vector<1x128xf32> to vector<16x128xf32>
    %5 = arith.addf %2, %4 : vector<16x128xf32>
    %cst_5 = arith.constant 0.000000e+00 : f32
    %6 = vector.broadcast %cst_5 : f32 to vector<16x128xf32>
    %7 = arith.maximumf %5, %6 : vector<16x128xf32>
    %c0_6 = arith.constant 0 : index
    %c0_7 = arith.constant 0 : index
    %8 = vector.load %arg4[%c0_6, %c0_7] : memref<128x128xf32, #tpu.memory_space<vmem>>, vector<128x128xf32>
    %cst_8 = arith.constant dense<0.000000e+00> : vector<16x128xf32>
    %9 = tpu.matmul %7, %8, %cst_8 {dimension_numbers = #tpu.dot_dimension_numbers<[1], [0], [0], [1], [0, 0, 1, 1], [], []>} : vector<16x128xf32>, vector<128x128xf32>, vector<16x128xf32> -> vector<16x128xf32>
    %c0_9 = arith.constant 0 : index
    %c0_10 = arith.constant 0 : index
    %10 = vector.load %arg5[%c0_9, %c0_10] : memref<1x128xf32, #tpu.memory_space<vmem>>, vector<1x128xf32>
    %11 = vector.broadcast %10 : vector<1x128xf32> to vector<16x128xf32>
    %12 = arith.addf %9, %11 : vector<16x128xf32>
    %cst_11 = arith.constant 0.000000e+00 : f32
    %13 = vector.broadcast %cst_11 : f32 to vector<16x128xf32>
    %14 = arith.maximumf %12, %13 : vector<16x128xf32>
    %c0_12 = arith.constant 0 : index
    %c0_13 = arith.constant 0 : index
    %15 = vector.load %arg6[%c0_12, %c0_13] : memref<128x128xf32, #tpu.memory_space<vmem>>, vector<128x128xf32>
    %cst_14 = arith.constant dense<0.000000e+00> : vector<16x128xf32>
    %16 = tpu.matmul %14, %15, %cst_14 {dimension_numbers = #tpu.dot_dimension_numbers<[1], [0], [0], [1], [0, 0, 1, 1], [], []>} : vector<16x128xf32>, vector<128x128xf32>, vector<16x128xf32> -> vector<16x128xf32>
    %c0_15 = arith.constant 0 : index
    %c0_16 = arith.constant 0 : index
    %17 = vector.load %arg7[%c0_15, %c0_16] : memref<1x128xf32, #tpu.memory_space<vmem>>, vector<1x128xf32>
    %18 = vector.broadcast %17 : vector<1x128xf32> to vector<16x128xf32>
    %19 = arith.addf %16, %18 : vector<16x128xf32>
    %c0_17 = arith.constant 0 : index
    %c0_18 = arith.constant 0 : index
    %20 = vector.load %arg8[%c0_17, %c0_18] : memref<16x128xf32, #tpu.memory_space<vmem>>, vector<16x128xf32>
    tpu.vector_store %arg8[%c0_17, %c0_18], %19 {strides = array<i32>} : memref<16x128xf32, #tpu.memory_space<vmem>>, vector<16x128xf32>,
    return
  }
  func.func @transform_0(%arg0: i32) -> (i32, i32) {
    %c0_i32 = arith.constant 0 : i32
    %c0_i32_0 = arith.constant 0 : i32
    return %arg0, %c0_i32 : i32, i32
  }
  func.func @transform_1(%arg0: i32) -> (i32, i32) {
    %c0_i32 = arith.constant 0 : i32
    %c0_i32_0 = arith.constant 0 : i32
    %c0_i32_1 = arith.constant 0 : i32
    return %c0_i32, %c0_i32_0 : i32, i32
  }
  func.func @transform_2(%arg0: i32) -> (i32, i32) {
    %c0_i32 = arith.constant 0 : i32
    %c0_i32_0 = arith.constant 0 : i32
    %c0_i32_1 = arith.constant 0 : i32
    return %c0_i32, %c0_i32_0 : i32, i32
  }
  func.func @transform_3(%arg0: i32) -> (i32, i32) {
    %c0_i32 = arith.constant 0 : i32
    %c0_i32_0 = arith.constant 0 : i32
    %c0_i32_1 = arith.constant 0 : i32
    return %c0_i32, %c0_i32_0 : i32, i32
  }
  func.func @transform_4(%arg0: i32) -> (i32, i32) {
    %c0_i32 = arith.constant 0 : i32
    %c0_i32_0 = arith.constant 0 : i32
    %c0_i32_1 = arith.constant 0 : i32
    return %c0_i32, %c0_i32_0 : i32, i32
  }
  func.func @transform_5(%arg0: i32) -> (i32, i32) {
    %c0_i32 = arith.constant 0 : i32
    %c0_i32_0 = arith.constant 0 : i32
    %c0_i32_1 = arith.constant 0 : i32
    return %c0_i32, %c0_i32_0 : i32, i32
  }
  func.func @transform_6(%arg0: i32) -> (i32, i32) {
    %c0_i32 = arith.constant 0 : i32
    %c0_i32_0 = arith.constant 0 : i32
    %c0_i32_1 = arith.constant 0 : i32
    return %c0_i32, %c0_i32_0 : i32, i32
  }
  func.func @transform_7(%arg0: i32) -> (i32, i32) {
    %c0_i32 = arith.constant 0 : i32
    %c0_i32_0 = arith.constant 0 : i32
    return %arg0, %c0_i32 : i32, i32
  }
}

</mosaic_0001>

<bundles_post_ra>
// kernel: mlp_pallas.1
= control target key start
LH: loop header
LB: loop body
LE: loop exit
PB: predicated region body
PF: predicated region fallthrough
CT: control target
= control target key end

     0   :  { %12 = vsyncpa [#allocation3], 0  ;;  %s874_s0 = inlined_call_operand.vmem [shape: f32[16,128], index: 0, kind: input, shape index: {}]   ;;  %s875_s1 = inlined_call_operand.hbm [shape: f32[128,128], index: 1, kind: input, shape index: {}]   ;;  %s876_s2 = inlined_call_operand.vmem [shape: f32[1,128], index: 2, kind: input, shape index: {}]   ;;  %s877_s3 = inlined_call_operand.hbm [shape: f32[128,128], index: 3, kind: input, shape index: {}]   ;;  %s878_s4 = inlined_call_operand.vmem [shape: f32[1,128], index: 4, kind: input, shape index: {}]   ;;  %s879_s5 = inlined_call_operand.hbm [shape: f32[128,128], index: 5, kind: input, shape index: {}]   ;;  %s880_s6 = inlined_call_operand.vmem [shape: f32[1,128], index: 6, kind: input, shape index: {}]   ;;  %s881_s7 = inlined_call_operand.hbm [shape: f32[16,128], index: 7, kind: output, shape index: {}]  }
   0x1   :  { %13 = vsyncpa [#allocation6], 0 }
   0x2   :  { %14 = vsyncpa [#allocation4], 0  ;;  %s746_s24 = smov [#allocation5]   ;;  %s747_s26 = smov [#allocation2]  }
   0x3   :  { %s36_s25 = sshll.u32 %s746_s24, 4  ;;  %s22_s27 = sshll.u32 %s747_s26, 4  ;;  %s37_s25 = int_to_ptr.vmem [resolvable:$true] %s36_s25  ;;  %s792_s27 = int_to_ptr.vmem [resolvable:$true] %s22_s27 }
   0x4   :  { %s652_s30 = scalar_lea.hbm %s877_s3, 2048 }
   0x5   :  { %p653_p0 = scmp.ne.s32.totalorder %s877_s3, %s652_s30  ;;  %p656_p1 = scmp.lt.u32.totalorder %s652_s30, %s877_s3 }
   0x7   :  { %p658_p2 = pnand %p656_p1, %p653_p0 }
   0x9   :  { %661 = shalt.err (!%p658_p2)
}
   0xa   :  { %s662_s12 = scalar_lea.vmem %s37_s25, 2048  ;;  %p667_p4 = scmp.lt.s32.totalorder %s37_s25, %s37_s25 }
   0xb   :  { %p663_p3 = scmp.ne.s32.totalorder %s37_s25, %s662_s12  ;;  %p668_p5 = scmp.lt.s32.totalorder %s662_s12, %s662_s12 }
   0xd   :  { %p669_p6 = por %p668_p5, %p667_p4 }
   0xf   :  { %p670_p7 = pnand %p669_p6, %p663_p3 }
  0x11   :  { %673 = shalt.err (!%p670_p7)
}
  0x12   :  { %s748_s13 = smov 128   ;;  %s749_s14 = smov 8  }
  0x13   :  { %42 = dma.hbm_to_vmem [thread:$0]  %s877_s3, 2048, %s37_s25, [#allocation6], %s748_s13, %s748_s13, %s749_s14  }
  0x14   :  { %s674_s19 = scalar_lea.hbm %s875_s1, 2048 }
  0x15   :  { %p675_p8 = scmp.ne.s32.totalorder %s875_s1, %s674_s19  ;;  %p678_p9 = scmp.lt.u32.totalorder %s674_s19, %s875_s1 }
  0x17   :  { %p680_p10 = pnand %p678_p9, %p675_p8 }
  0x19   :  { %683 = shalt.err (!%p680_p10)
}
  0x1a   :  { %s684_s24 = scalar_lea.vmem %s792_s27, 2048  ;;  %p689_p12 = scmp.lt.s32.totalorder %s792_s27, %s792_s27 }
  0x1b   :  { %p685_p11 = scmp.ne.s32.totalorder %s792_s27, %s684_s24  ;;  %p690_p13 = scmp.lt.s32.totalorder %s684_s24, %s684_s24 }
  0x1d   :  { %p691_p0 = por %p690_p13, %p689_p12 }
  0x1f   :  { %p692_p1 = pnand %p691_p0, %p685_p11 }
  0x21   :  { %695 = shalt.err (!%p692_p1)
}
  0x22   :  { %28 = dma.hbm_to_vmem [thread:$0]  %s875_s1, 2048, %s792_s27, [#allocation3], %s748_s13, %s748_s13, %s749_s14  }
  0x23   :  { %s750_s26 = smov [#allocation7]   ;;  %s696_s8 = scalar_lea.hbm %s879_s5, 2048 }
  0x24   :  { %s50_s28 = sshll.u32 %s750_s26, 4  ;;  %p697_p2 = scmp.ne.s32.totalorder %s879_s5, %s696_s8  ;;  %s51_s28 = int_to_ptr.vmem [resolvable:$true] %s50_s28 }
  0x25   :  { %p700_p3 = scmp.lt.u32.totalorder %s696_s8, %s879_s5 }
  0x27   :  { %p702_p4 = pnand %p700_p3, %p697_p2 }
  0x29   :  { %705 = shalt.err (!%p702_p4)
}
  0x2a   :  { %s706_s15 = scalar_lea.vmem %s51_s28, 2048  ;;  %p711_p6 = scmp.lt.s32.totalorder %s51_s28, %s51_s28 }
  0x2b   :  { %p707_p5 = scmp.ne.s32.totalorder %s51_s28, %s706_s15  ;;  %p712_p7 = scmp.lt.s32.totalorder %s706_s15, %s706_s15 }
  0x2d   :  { %p713_p8 = por %p712_p7, %p711_p6 }
  0x2f   :  { %p714_p9 = pnand %p713_p8, %p707_p5 }
  0x31   :  { %717 = shalt.err (!%p714_p9)
}
  0x32   :  { %56 = dma.hbm_to_vmem [thread:$0]  %s879_s5, 2048, %s51_s28, [#allocation6], %s748_s13, %s748_s13, %s749_s14  }
  0x33   :  { %740 = dma.done.wait [#allocation3], 2048  }
  0x34   :  { %741 = vsyncadd [#allocation3], 4294965248 }
  0x35   :  { %742 = dma.done.wait [#allocation6], 4096  }
  0x36   :  { %743 = vsyncadd [#allocation6], 4294963200  ;;  %v70_v0 = vld [vmem:[#allocation2] sm:$0xff]  ;;  %v71_v1 = vld [vmem:[#allocation2 + $0x8] sm:$0xff]  ;;  %s751_s23 = smov [#allocation8]  }
  0x37   :  { %v72_v2 = vld [vmem:[#allocation2 + $0x10] sm:$0xff]  ;;  %v550_v3 = vpack.c.bf16 %v71_v1, %v70_v0  ;;  %v73_v4 = vld [vmem:[#allocation2 + $0x18] sm:$0xff]  ;;  %v74_v6 = vld [vmem:[#allocation2 + $0x20] sm:$0xff]  ;;  %s375_s24 = sshll.u32 %s751_s23, 4  ;;  %s376_s24 = int_to_ptr.vmem [resolvable:$true] %s375_s24 }
  0x38   :  { %v554_v5 = vpack.c.bf16 %v73_v4, %v72_v2  ;;  %v75_v7 = vld [vmem:[#allocation2 + $0x28] sm:$0xff]  ;;  %v76_v9 = vld [vmem:[#allocation2 + $0x30] sm:$0xff]  ;;  %v77_v10 = vld [vmem:[#allocation2 + $0x38] sm:$0xff]  ;;  %p723_p11 = scmp.lt.s32.totalorder %s376_s24, %s376_s24 }
  0x39   :  { %551 = vmatprep.subr.bf16.mxu0 %v550_v3  ;;  %v558_v8 = vpack.c.bf16 %v75_v7, %v74_v6  ;;  %v68_v11 = vld [vmem:[%s874_s0] sm:$0xff]  ;;  %v171_v13 = vld [vmem:[#allocation5 + $0x8] sm:$0xff]  ;;  %v172_v14 = vld [vmem:[#allocation5 + $0x10] sm:$0xff]  ;;  %v562_v20 = vpack.c.bf16 %v77_v10, %v76_v9 }
  0x3a   :  { %553 = vmatpush3.bf16.msra.mxu0 %v550_v3  ;;  %477 = vmatprep.mubr.f32.mxu0 %v68_v11  ;;  %v170_v12 = vld [vmem:[#allocation5] sm:$0xff]  ;;  %v173_v16 = vld [vmem:[#allocation5 + $0x18] sm:$0xff]  ;;  %v175_v19 = vld [vmem:[#allocation5 + $0x28] sm:$0xff] }
  0x3b   :  { %555 = vmatprep.subr.bf16.mxu0 %v554_v5  ;;  %v582_v15 = vpack.c.bf16 %v171_v13, %v170_v12  ;;  %v586_v17 = vpack.c.bf16 %v173_v16, %v172_v14  ;;  %v174_v18 = vld [vmem:[#allocation5 + $0x20] sm:$0xff]  ;;  %v79_v22 = vld [vmem:[#allocation2 + $0x48] sm:$0xff]  ;;  %v176_v24 = vld [vmem:[#allocation5 + $0x30] sm:$0xff] }
  0x3c   :  { %v78_v21 = vld [vmem:[#allocation2 + $0x40] sm:$0xff]  ;;  %v590_v23 = vpack.c.bf16 %v175_v19, %v174_v18  ;;  %v177_v25 = vld [vmem:[#allocation5 + $0x38] sm:$0xff]  ;;  %v80_v27 = vld [vmem:[#allocation2 + $0x50] sm:$0xff] }
  0x3d   :  { %583 = vmatprep.subr.bf16.mxu1 %v582_v15  ;;  %v566_v26 = vpack.c.bf16 %v79_v22, %v78_v21  ;;  %v81_v28 = vld [vmem:[#allocation2 + $0x58] sm:$0xff]  ;;  %v594_v29 = vpack.c.bf16 %v177_v25, %v176_v24  ;;  %v178_v30 = vld [vmem:[#allocation5 + $0x40] sm:$0xff]  ;;  %v179_v31 = vld [vmem:[#allocation5 + $0x48] sm:$0xff] }
  0x3e   :  { %557 = vmatpush3.bf16.msra.mxu0 %v554_v5  ;;  %585 = vmatpush3.bf16.msra.mxu1 %v582_v15  ;;  %v570_v32 = vpack.c.bf16 %v81_v28, %v80_v27  ;;  %v82_v33 = vld [vmem:[#allocation2 + $0x60] sm:$0xff]  ;;  %v83_v34 = vld [vmem:[#allocation2 + $0x68] sm:$0xff]  ;;  %v598_v35 = vpack.c.bf16 %v179_v31, %v178_v30  ;;  %v180_v36 = vld [vmem:[#allocation5 + $0x50] sm:$0xff] }
  0x3f   :  { %559 = vmatprep.subr.bf16.mxu0 %v558_v8  ;;  %587 = vmatprep.subr.bf16.mxu1 %v586_v17  ;;  %v181_v37 = vld [vmem:[#allocation5 + $0x58] sm:$0xff]  ;;  %v574_v38 = vpack.c.bf16 %v83_v34, %v82_v33  ;;  %v84_v39 = vld [vmem:[#allocation2 + $0x70] sm:$0xff]  ;;  %v182_v42 = vld [vmem:[#allocation5 + $0x60] sm:$0xff] }
  0x40   :  { %v85_v40 = vld [vmem:[#allocation2 + $0x78] sm:$0xff]  ;;  %v602_v41 = vpack.c.bf16 %v181_v37, %v180_v36  ;;  %v183_v43 = vld [vmem:[#allocation5 + $0x68] sm:$0xff]  ;;  %v184_v47 = vld [vmem:[#allocation5 + $0x70] sm:$0xff] }
  0x41   :  { %v578_v44 = vpack.c.bf16 %v85_v40, %v84_v39  ;;  %v606_v45 = vpack.c.bf16 %v183_v43, %v182_v42  ;;  %v69_v46 = vld [vmem:[%s874_s0 + $0x8] sm:$0xff]  ;;  %v185_v48 = vld [vmem:[#allocation5 + $0x78] sm:$0xff]  ;;  %v270_v50 = vld [vmem:[#allocation7] sm:$0xff] }
  0x42   :  { %561 = vmatpush3.bf16.msra.mxu0 %v558_v8  ;;  %589 = vmatpush3.bf16.msra.mxu1 %v586_v17  ;;  %v610_v49 = vpack.c.bf16 %v185_v48, %v184_v47  ;;  %v271_v51 = vld [vmem:[#allocation7 + $0x8] sm:$0xff]  ;;  %v272_v52 = vld [vmem:[#allocation7 + $0x10] sm:$0xff]  ;;  %v273_v54 = vld [vmem:[#allocation7 + $0x18] sm:$0xff] }
  0x43   :  { %563 = vmatprep.subr.bf16.mxu0 %v562_v20  ;;  %591 = vmatprep.subr.bf16.mxu1 %v590_v23  ;;  %v614_v53 = vpack.c.bf16 %v271_v51, %v270_v50  ;;  %v618_v55 = vpack.c.bf16 %v273_v54, %v272_v52  ;;  %v274_v56 = vld [vmem:[#allocation7 + $0x20] sm:$0xff]  ;;  %v275_v57 = vld [vmem:[#allocation7 + $0x28] sm:$0xff]  ;;  %v276_v59 = vld [vmem:[#allocation7 + $0x30] sm:$0xff] }
  0x44   :  { %v622_v58 = vpack.c.bf16 %v275_v57, %v274_v56  ;;  %v277_v60 = vld [vmem:[#allocation7 + $0x38] sm:$0xff]  ;;  %v278_v62 = vld [vmem:[#allocation7 + $0x40] sm:$0xff]  ;;  %v279_v63 = vld [vmem:[#allocation7 + $0x48] sm:$0xff] }
  0x45   :  { %v626_v61 = vpack.c.bf16 %v277_v60, %v276_v59  ;;  %v630_v0 = vpack.c.bf16 %v279_v63, %v278_v62  ;;  %v280_v1 = vld [vmem:[#allocation7 + $0x50] sm:$0xff]  ;;  %v281_v2 = vld [vmem:[#allocation7 + $0x58] sm:$0xff]  ;;  %v282_v4 = vld [vmem:[#allocation7 + $0x60] sm:$0xff] }
  0x46   :  { %565 = vmatpush3.bf16.msra.mxu0 %v562_v20  ;;  %593 = vmatpush3.bf16.msra.mxu1 %v590_v23  ;;  %v634_v3 = vpack.c.bf16 %v281_v2, %v280_v1  ;;  %v283_v5 = vld [vmem:[#allocation7 + $0x68] sm:$0xff]  ;;  %v388_v7 = vld [vmem:[%s876_s2] ss:$0 sm:$0xff]  ;;  %v284_v14 = vld [vmem:[#allocation7 + $0x70] sm:$0xff] }
  0x47   :  { %567 = vmatprep.subr.bf16.mxu0 %v566_v26  ;;  %595 = vmatprep.subr.bf16.mxu1 %v594_v29  ;;  %v638_v6 = vpack.c.bf16 %v283_v5, %v282_v4  ;;  %v285_v15 = vld [vmem:[#allocation7 + $0x78] sm:$0xff]  ;;  %v389_v17 = vld [vmem:[%s878_s4] ss:$0 sm:$0xff]  ;;  %s718_s4 = scalar_lea.vmem %s376_s24, 256 }
  0x48   :  { %v642_v16 = vpack.c.bf16 %v285_v15, %v284_v14  ;;  %v390_v24 = vld [vmem:[%s880_s6] ss:$0 sm:$0xff]  ;;  %p719_p10 = scmp.ne.s32.totalorder %s376_s24, %s718_s4  ;;  %p724_p12 = scmp.lt.s32.totalorder %s718_s4, %s718_s4 }
  0x4a   :  { %569 = vmatpush3.bf16.msra.mxu0 %v566_v26  ;;  %597 = vmatpush3.bf16.msra.mxu1 %v594_v29  ;;  %p725_p13 = por %p724_p12, %p723_p11 }
  0x4b   :  { %571 = vmatprep.subr.bf16.mxu0 %v570_v32  ;;  %599 = vmatprep.subr.bf16.mxu1 %v598_v35 }
  0x4c   :  { %p726_p0 = pnand %p725_p13, %p719_p10 }
  0x4e   :  { %573 = vmatpush3.bf16.msra.mxu0 %v570_v32  ;;  %601 = vmatpush3.bf16.msra.mxu1 %v598_v35 }
  0x4f   :  { %575 = vmatprep.subr.bf16.mxu0 %v574_v38  ;;  %603 = vmatprep.subr.bf16.mxu1 %v602_v41 }
  0x52   :  { %577 = vmatpush3.bf16.msra.mxu0 %v574_v38  ;;  %605 = vmatpush3.bf16.msra.mxu1 %v602_v41 }
  0x53   :  { %579 = vmatprep.subr.bf16.mxu0 %v578_v44  ;;  %607 = vmatprep.subr.bf16.mxu1 %v606_v45 }
  0x56   :  { %581 = vmatpush3.bf16.msra.mxu0 %v578_v44  ;;  %609 = vmatpush3.bf16.msra.mxu1 %v606_v45 }
  0x57   :  { %611 = vmatprep.subr.bf16.mxu1 %v610_v49  ;;  %615 = vmatprep.subr.bf16.mxu0 %v614_v53 }
  0x59   :  { %478 = vmatmul.mubr.f32.vlgmr.msra.gmra.mrb[0].mxu0 %v69_v46 }
  0x5a   :  { %613 = vmatpush3.bf16.msra.mxu1 %v610_v49  ;;  %617 = vmatpush3.bf16.msra.mxu0 %v614_v53 }
  0x5b   :  { %619 = vmatprep.subr.bf16.mxu0 %v618_v55 }
  0x5e   :  { %621 = vmatpush3.bf16.msra.mxu0 %v618_v55 }
  0x5f   :  { %623 = vmatprep.subr.bf16.mxu0 %v622_v58 }
  0x62   :  { %625 = vmatpush3.bf16.msra.mxu0 %v622_v58 }
  0x63   :  { %627 = vmatprep.subr.bf16.mxu0 %v626_v61 }
  0x66   :  { %629 = vmatpush3.bf16.msra.mxu0 %v626_v61 }
  0x67   :  { %631 = vmatprep.subr.bf16.mxu0 %v630_v0 }
  0x6a   :  { %633 = vmatpush3.bf16.msra.mxu0 %v630_v0 }
  0x6b   :  { %635 = vmatprep.subr.bf16.mxu0 %v634_v3 }
  0x6e   :  { %637 = vmatpush3.bf16.msra.mxu0 %v634_v3 }
  0x6f   :  { %639 = vmatprep.subr.bf16.mxu0 %v638_v6 }
  0x72   :  { %641 = vmatpush3.bf16.msra.mxu0 %v638_v6 }
  0x73   :  { %643 = vmatprep.subr.bf16.mxu0 %v642_v16 }
  0x76   :  { %645 = vmatpush3.bf16.msra.mxu0 %v642_v16 }
 0x12c   :  { %v479_v8 = vpop.f32.mrb[0].mxu0 }
 0x12d   :  { %v165_v9 = vadd.f32 %v479_v8, %v388_v7  ;;  %v159_v10 = vpop.f32.mrb[1].mxu0 }
 0x12e   :  { %v160_v11 = vadd.f32 %v388_v7, %v159_v10 }
 0x12f   :  { %v169_v13 = vmax.f32 %v165_v9, 0.0 }
 0x130   :  { %v168_v12 = vmax.f32 %v160_v11, 0.0 }
 0x132   :  { %512 = vmatprep.mubr.f32.mxu1 %v168_v12 }
 0x133   :  { %513 = vmatmul.mubr.f32.vlgmr.msra.gmra.mrb[0].mxu1 %v169_v13 }
 0x206   :  { %v514_v18 = vpop.f32.mrb[0].mxu1 }
 0x207   :  { %v265_v19 = vadd.f32 %v514_v18, %v389_v17  ;;  %v259_v20 = vpop.f32.mrb[1].mxu1 }
 0x208   :  { %v260_v21 = vadd.f32 %v389_v17, %v259_v20 }
 0x209   :  { %v269_v23 = vmax.f32 %v265_v19, 0.0 }
 0x20a   :  { %v268_v22 = vmax.f32 %v260_v21, 0.0 }
 0x20c   :  { %547 = vmatprep.mubr.f32.mxu0 %v268_v22 }
 0x20d   :  { %548 = vmatmul.mubr.f32.vlgmr.msra.gmra.mrb[2].mxu0 %v269_v23 }
 0x2e0   :  { %v549_v25 = vpop.f32.mrb[2].mxu0 }
 0x2e1   :  { %v365_v26 = vadd.f32 %v549_v25, %v390_v24  ;;  %v359_v27 = vpop.f32.mrb[3].mxu0 }
 0x2e2   :  { %v360_v28 = vadd.f32 %v390_v24, %v359_v27 }
 0x2e3   :  { %369 = vst [vmem:[#allocation8 + $0x8] sm:$0xff] %v365_v26 }
 0x2e4   :  { %368 = vst [vmem:[#allocation8] sm:$0xff] %v360_v28 }
 0x2e5   :  { %729 = shalt.err (!%p726_p0)
}
 0x2e6   :  { %s730_s6 = scalar_lea.hbm %s881_s7, 256 }
 0x2e7   :  { %p731_p1 = scmp.ne.s32.totalorder %s881_s7, %s730_s6  ;;  %p734_p2 = scmp.lt.u32.totalorder %s730_s6, %s881_s7 }
 0x2e9   :  { %p736_p3 = pnand %p734_p2, %p731_p1 }
 0x2eb   :  { %739 = shalt.err (!%p736_p3)
}
 0x2ec   :  { %381 = dma.vmem_to_hbm [thread:$0]  %s376_s24, 256, %s881_s7, [#allocation4], %s748_s13, %s748_s13, %s749_s14  }
 0x2ed   :  { %744 = dma.done.wait [#allocation4], 256  }
 0x2ee   :  { %745 = vsyncadd [#allocation4], 4294967040 }
 0x2ef   :  { %385 = vsyncpa [#allocation3], 1 }
 0x2f0   :  { %386 = vsyncpa [#allocation6], 1 }
 0x2f1   :  { %387 = vsyncpa [#allocation4], 1 }

</bundles_post_ra>
